<compile_context>
chip_gen: v7x
topology: tpu7x:2x2x1
jax: 0.10.0
libtpu: 0.0.40
codegen_flags: <defaults>
</compile_context>

<pallas_src>
import functools
import math

import jax
import jax.numpy as jnp
from jax.experimental import pallas as pl
from jax.experimental.pallas import tpu as pltpu


def _round_up(a, b):
    return ((a + b - 1) // b) * b


def _vx_embedding_kernel(x_ref, w_ref, b_ref, out_ref, *, eps):
    # x_ref: (BR, W*Cin) f32/bf16; w_ref: (W*Cin, W*Cout) block-diagonal;
    # b_ref: (1, W*Cout) f32; out_ref: (BR, W*Cout) f32/bf16.
    x = x_ref[...].astype(jnp.float32)

    # InstanceNorm #1: per (n, h) row over all (c, w) -- pure lane reduction.
    mu1 = jnp.mean(x, axis=-1, keepdims=True)
    xc = x - mu1
    var1 = jnp.mean(xc * xc, axis=-1, keepdims=True)      # biased variance
    xn = xc * jax.lax.rsqrt(var1 + eps)

    # 1x1 conv folded into a single lane-dense 2-D MXU matmul:
    # (BR, W*Cin) @ (W*Cin, W*Cout), f32 accumulation.
    y = jnp.dot(xn.astype(w_ref.dtype), w_ref[...],
                preferred_element_type=jnp.float32) + b_ref[...]

    # InstanceNorm #2: per (n, h) row over all (o, w).
    mu2 = jnp.mean(y, axis=-1, keepdims=True)
    yc = y - mu2
    var2 = jnp.mean(yc * yc, axis=-1, keepdims=True)
    out_ref[...] = (yc * jax.lax.rsqrt(var2 + eps)).astype(out_ref.dtype)


def _invariant_spec(shape):
    """BlockSpec for a grid-invariant operand: one VMEM buffer is enough."""
    index_map = lambda i: (0, 0)
    if hasattr(pl, "Buffered"):
        try:
            return pl.BlockSpec(shape, index_map, pipeline_mode=pl.Buffered(1))
        except TypeError:  # older jax without pipeline_mode kwarg
            pass
    return pl.BlockSpec(shape, index_map)


def make_vx_embedding_params(w_emb, b_emb, W, *, mxu_dtype=jnp.bfloat16):
    """Parameter-init-time folding (hoisted out of the forward path).

    w_emb: (Cin, Cout) = conv weight[o, c].T;  b_emb: (Cout,).
    Returns (w_big, b_big) with w_big = kron(I_W, w_emb): (W*Cin, W*Cout)."""
    Cin, Cout = w_emb.shape
    w_big = jnp.kron(jnp.eye(W, dtype=jnp.float32),
                     w_emb.astype(jnp.float32)).astype(mxu_dtype)
    b_big = jnp.tile(b_emb.astype(jnp.float32), W).reshape(1, W * Cout)
    return w_big, b_big


def vx_embedding_rows(x_rows, w_big, b_big, *, eps=1e-5, block_rows=None,
                      out_dtype=jnp.float32):
    """Relayout-free entry point.  x_rows: (rows, W*Cin) with row = n*H + h,
    col = w*Cin + c.  Returns (rows, W*Cout) with col = w*Cout + o."""
    rows, in_cols = x_rows.shape
    kin, out_cols = w_big.shape
    assert kin == in_cols, (kin, in_cols)

    if block_rows is None:
        # 512-row tiles sit near the HBM roofline (vs ~63% at 256) while the
        # double-buffered working set stays well under every generation's
        # scoped-VMEM default (incl. v7x's 64 MiB physical VMEM).  Clamp so
        # the grid keeps >= 2 "parallel" steps when possible: v7x has two
        # TensorCores and a single-step grid would idle one of them.
        block_rows = 512
        if rows >= 16:
            block_rows = min(block_rows, max(8, (rows // 2) // 8 * 8))
    block_rows = _round_up(max(8, min(block_rows, _round_up(rows, 8))), 8)

    rows_pad = pl.cdiv(rows, block_rows) * block_rows
    if rows_pad != rows:
        # Padded rows produce harmless finite values (sliced off below).
        x_rows = jnp.pad(x_rows, ((0, rows_pad - rows), (0, 0)))

    in_bytes = rows_pad * in_cols * jnp.dtype(x_rows.dtype).itemsize
    out_bytes = rows_pad * out_cols * jnp.dtype(out_dtype).itemsize
    param_bytes = (kin * out_cols * jnp.dtype(w_big.dtype).itemsize
                   + out_cols * jnp.dtype(b_big.dtype).itemsize)
    cost = pl.CostEstimate(
        flops=2 * rows_pad * in_cols * out_cols
              + 8 * rows_pad * (in_cols + out_cols),
        transcendentals=2 * rows_pad,
        bytes_accessed=in_bytes + out_bytes + param_bytes)

    out = pl.pallas_call(
        functools.partial(_vx_embedding_kernel, eps=eps),
        out_shape=jax.ShapeDtypeStruct((rows_pad, out_cols), out_dtype),
        grid=(rows_pad // block_rows,),
        in_specs=[
            # Input stays 64 lanes wide on purpose (no zero-padding to 128).
            pl.BlockSpec((block_rows, in_cols), lambda i: (i, 0)),
            _invariant_spec((kin, out_cols)),
            _invariant_spec((1, out_cols)),
        ],
        out_specs=pl.BlockSpec((block_rows, out_cols), lambda i: (i, 0)),
        compiler_params=pltpu.CompilerParams(
            dimension_semantics=("parallel",)),
        cost_estimate=cost,
    )(x_rows, w_big, b_big)

    return out[:rows] if rows_pad != rows else out


@functools.partial(jax.jit,
                   static_argnames=("eps", "block_rows", "io_dtype",
                                    "out_dtype"))
def vx_embedding_forward(x_nchw, w_big, b_big, *, eps=1e-5, block_rows=None,
                         io_dtype=jnp.float32, out_dtype=jnp.float32):
    """NCHW-in / NCHW-out forward matching the PyTorch module.  Fully jitted so
    the two relayouts fuse with the cast/pad/slice and dispatch once around the
    single Pallas call.  (Consumers able to keep the rows layout should call
    vx_embedding_rows directly and skip the relayouts.)"""
    N, Cin, H, W = x_nchw.shape
    out_cols = b_big.shape[-1]
    Cout = out_cols // W
    rows = N * H

    # row = n*H + h, col = w*Cin + c (one fused relayout + cast pass).
    x_rows = jnp.transpose(x_nchw, (0, 2, 3, 1)).reshape(rows, W * Cin)
    x_rows = x_rows.astype(io_dtype)

    out = vx_embedding_rows(x_rows, w_big, b_big, eps=eps,
                            block_rows=block_rows, out_dtype=out_dtype)

    out = out.reshape(N, H, W, Cout)
    return jnp.transpose(out, (0, 3, 1, 2))


def vx_embedding_ref(x_nchw, w_emb, b_emb, *, eps=1e-5):
    """Pure-JAX f32 reference with the exact PyTorch forward semantics."""
    def inorm(t):
        # InstanceNorm2d(1, affine=False) applied to t.transpose(1, 2):
        # normalise each (n, h) slice over (channel, w), biased variance.
        mu = jnp.mean(t, axis=(1, 3), keepdims=True)
        var = jnp.mean((t - mu) ** 2, axis=(1, 3), keepdims=True)
        return (t - mu) * jax.lax.rsqrt(var + eps)

    xn = inorm(x_nchw.astype(jnp.float32))
    y = jnp.einsum('nchw,co->nohw', xn, w_emb.astype(jnp.float32))
    y = y + b_emb.reshape(1, -1, 1, 1)
    return inorm(y)


if __name__ == "__main__":
    # VxEmbedding with ch=4, inter_ch=8 (the only params the forward uses);
    # input X of shape (N=2, ch=4, H=16, W=16).
    N, Cin, Cout, H, W = 2, 4, 8, 16, 16

    key = jax.random.PRNGKey(0)
    k_w, k_x = jax.random.split(key, 2)

    # xavier_uniform_ on the (Cout, Cin, 1, 1) conv weight, bias zeroed
    # (matches VxEmbedding._init_parameters); stored transposed as (Cin, Cout).
    bound = math.sqrt(6.0 / (Cin + Cout))
    w_emb = jax.random.uniform(k_w, (Cin, Cout), jnp.float32, -bound, bound)
    b_emb = jnp.zeros((Cout,), jnp.float32)

    x = jax.random.normal(k_x, (N, Cin, H, W), jnp.float32)

    ref = vx_embedding_ref(x, w_emb, b_emb)

    # Parameter folding done ONCE at init time (not per forward call).
    w_big_f32, b_big = make_vx_embedding_params(w_emb, b_emb, W,
                                                mxu_dtype=jnp.float32)
    w_big_bf16, _ = make_vx_embedding_params(w_emb, b_emb, W,
                                             mxu_dtype=jnp.bfloat16)

    # 1) Full-f32 path: tight numerical check against the reference.
    out32 = jax.block_until_ready(
        vx_embedding_forward(x, w_big_f32, b_big,
                             io_dtype=jnp.float32, out_dtype=jnp.float32))
    assert out32.shape == (N, Cout, H, W)
    err_f32 = float(jnp.max(jnp.abs(out32 - ref)))
    assert jnp.allclose(out32, ref, rtol=1e-4, atol=1e-4), err_f32

    # 2) Default perf path: bf16 HBM I/O + bf16 MXU operands, f32 math inside.
    #    Relative-error check (post-norm outputs are O(1)).
    out_bf = jax.block_until_ready(
        vx_embedding_forward(x, w_big_bf16, b_big,
                             io_dtype=jnp.bfloat16, out_dtype=jnp.bfloat16))
    assert out_bf.shape == (N, Cout, H, W)
    rel_err = float(jnp.max(jnp.abs(out_bf.astype(jnp.float32) - ref))
                    / (jnp.max(jnp.abs(ref)) + 1e-12))
    assert rel_err <= 3e-2, rel_err

    print("KERNEL_OK")
</pallas_src>

<mosaic_0001>
module attributes {stable_mosaic.version = 11 : i64} {
  func.func @_vx_embedding_kernel(%arg0: i32, %arg1: memref<16x64xf32, #tpu.memory_space<vmem>>, %arg2: memref<64x128xf32, #tpu.memory_space<vmem>>, %arg3: memref<1x128xf32, #tpu.memory_space<vmem>>, %arg4: memref<16x128xf32, #tpu.memory_space<vmem>>) attributes {dimension_semantics = [#tpu.dimension_semantics<parallel>], iteration_bounds = array<i64: 2>, scalar_prefetch = 0 : i64, scratch_operands = 0 : i64, tpu.core_type = #tpu.core_type<tc>, window_params = [{transform_indices = @transform_0, window_bounds = array<i64: 16, 64>}, {pipeline_mode = #tpu.pipeline_mode<synchronous>, transform_indices = @transform_1, window_bounds = array<i64: 64, 128>}, {pipeline_mode = #tpu.pipeline_mode<synchronous>, transform_indices = @transform_2, window_bounds = array<i64: 1, 128>}, {transform_indices = @transform_3, window_bounds = array<i64: 16, 128>}]} {
    %c0 = arith.constant 0 : index
    %c0_0 = arith.constant 0 : index
    %0 = vector.load %arg1[%c0, %c0_0] : memref<16x64xf32, #tpu.memory_space<vmem>>, vector<16x64xf32>
    %cst = arith.constant dense<0.000000e+00> : vector<16xf32>
    %1 = vector.multi_reduction <add>, %0, %cst [1] : vector<16x64xf32> to vector<16xf32>
    %2 = vector.shape_cast %1 : vector<16xf32> to vector<16x1xf32>
    %cst_1 = arith.constant 6.400000e+01 : f32
    %3 = vector.broadcast %cst_1 : f32 to vector<16x1xf32>
    %4 = arith.divf %2, %3 : vector<16x1xf32>
    %5 = vector.broadcast %4 : vector<16x1xf32> to vector<16x64xf32>
    %6 = arith.subf %0, %5 : vector<16x64xf32>
    %7 = arith.mulf %6, %6 : vector<16x64xf32>
    %cst_2 = arith.constant dense<0.000000e+00> : vector<16xf32>
    %8 = vector.multi_reduction <add>, %7, %cst_2 [1] : vector<16x64xf32> to vector<16xf32>
    %9 = vector.shape_cast %8 : vector<16xf32> to vector<16x1xf32>
    %cst_3 = arith.constant 6.400000e+01 : f32
    %10 = vector.broadcast %cst_3 : f32 to vector<16x1xf32>
    %11 = arith.divf %9, %10 : vector<16x1xf32>
    %cst_4 = arith.constant 9.99999974E-6 : f32
    %12 = vector.broadcast %cst_4 : f32 to vector<16x1xf32>
    %13 = arith.addf %11, %12 : vector<16x1xf32>
    %14 = math.rsqrt %13 : vector<16x1xf32>
    %15 = vector.broadcast %14 : vector<16x1xf32> to vector<16x64xf32>
    %16 = arith.mulf %6, %15 : vector<16x64xf32>
    %c0_5 = arith.constant 0 : index
    %c0_6 = arith.constant 0 : index
    %17 = vector.load %arg2[%c0_5, %c0_6] : memref<64x128xf32, #tpu.memory_space<vmem>>, vector<64x128xf32>
    %cst_7 = arith.constant dense<0.000000e+00> : vector<16x128xf32>
    %18 = tpu.matmul %16, %17, %cst_7 {dimension_numbers = #tpu.dot_dimension_numbers<[1], [0], [0], [1], [0, 0, 1, 1], [], []>} : vector<16x64xf32>, vector<64x128xf32>, vector<16x128xf32> -> vector<16x128xf32>
    %c0_8 = arith.constant 0 : index
    %c0_9 = arith.constant 0 : index
    %19 = vector.load %arg3[%c0_8, %c0_9] : memref<1x128xf32, #tpu.memory_space<vmem>>, vector<1x128xf32>
    %20 = vector.broadcast %19 : vector<1x128xf32> to vector<16x128xf32>
    %21 = arith.addf %18, %20 : vector<16x128xf32>
    %cst_10 = arith.constant dense<0.000000e+00> : vector<16xf32>
    %22 = vector.multi_reduction <add>, %21, %cst_10 [1] : vector<16x128xf32> to vector<16xf32>
    %23 = vector.shape_cast %22 : vector<16xf32> to vector<16x1xf32>
    %cst_11 = arith.constant 1.280000e+02 : f32
    %24 = vector.broadcast %cst_11 : f32 to vector<16x1xf32>
    %25 = arith.divf %23, %24 : vector<16x1xf32>
    %26 = vector.broadcast %25 : vector<16x1xf32> to vector<16x128xf32>
    %27 = arith.subf %21, %26 : vector<16x128xf32>
    %28 = arith.mulf %27, %27 : vector<16x128xf32>
    %cst_12 = arith.constant dense<0.000000e+00> : vector<16xf32>
    %29 = vector.multi_reduction <add>, %28, %cst_12 [1] : vector<16x128xf32> to vector<16xf32>
    %30 = vector.shape_cast %29 : vector<16xf32> to vector<16x1xf32>
    %cst_13 = arith.constant 1.280000e+02 : f32
    %31 = vector.broadcast %cst_13 : f32 to vector<16x1xf32>
    %32 = arith.divf %30, %31 : vector<16x1xf32>
    %cst_14 = arith.constant 9.99999974E-6 : f32
    %33 = vector.broadcast %cst_14 : f32 to vector<16x1xf32>
    %34 = arith.addf %32, %33 : vector<16x1xf32>
    %35 = math.rsqrt %34 : vector<16x1xf32>
    %36 = vector.broadcast %35 : vector<16x1xf32> to vector<16x128xf32>
    %37 = arith.mulf %27, %36 : vector<16x128xf32>
    %c0_15 = arith.constant 0 : index
    %c0_16 = arith.constant 0 : index
    %38 = vector.load %arg4[%c0_15, %c0_16] : memref<16x128xf32, #tpu.memory_space<vmem>>, vector<16x128xf32>
    tpu.vector_store %arg4[%c0_15, %c0_16], %37 {strides = array<i32>} : memref<16x128xf32, #tpu.memory_space<vmem>>, vector<16x128xf32>,
    return
  }
  func.func @transform_0(%arg0: i32) -> (i32, i32) {
    %c0_i32 = arith.constant 0 : i32
    %c0_i32_0 = arith.constant 0 : i32
    return %arg0, %c0_i32 : i32, i32
  }
  func.func @transform_1(%arg0: i32) -> (i32, i32) {
    %c0_i32 = arith.constant 0 : i32
    %c0_i32_0 = arith.constant 0 : i32
    %c0_i32_1 = arith.constant 0 : i32
    return %c0_i32, %c0_i32_0 : i32, i32
  }
  func.func @transform_2(%arg0: i32) -> (i32, i32) {
    %c0_i32 = arith.constant 0 : i32
    %c0_i32_0 = arith.constant 0 : i32
    %c0_i32_1 = arith.constant 0 : i32
    return %c0_i32, %c0_i32_0 : i32, i32
  }
  func.func @transform_3(%arg0: i32) -> (i32, i32) {
    %c0_i32 = arith.constant 0 : i32
    %c0_i32_0 = arith.constant 0 : i32
    return %arg0, %c0_i32 : i32, i32
  }
}

</mosaic_0001>

<bundles_post_ra>
// kernel: vx_embedding_forward.1
= control target key start
LH: loop header
LB: loop body
LE: loop exit
PB: predicated region body
PF: predicated region fallthrough
CT: control target
= control target key end

     0   :  { %s484_s12 = smov 0   ;;  %s541_s0 = inlined_call_operand.vmem [shape: f32[32,64], index: 0, kind: input, shape index: {}]   ;;  %s542_s1 = inlined_call_operand.vmem [shape: f32[64,128], index: 1, kind: input, shape index: {}]   ;;  %s543_s2 = inlined_call_operand.vmem [shape: f32[1,128], index: 2, kind: input, shape index: {}]   ;;  %s544_s3 = inlined_call_operand.vmem [shape: f32[32,128], index: 3, kind: output, shape index: {}]  }
   0x1 LB: > { %s381_s13 = sadd.s32 4294967295, %s462_s12   ;;  %p385_p0 = scmp.ge.s32.totalorder %s462_s12, 1  ;;  %s462_s12 = sphi %s484_s12, %s13_s12  }
   0x2   : > { %p138_p1 = scmp.lt.s32.totalorder %s462_s12, 3 }
   0x4   : > { %p139_p2 = pnand %p385_p0, %p138_p1 }
   0x5   : > { %s386_s14 = sshll.u32 (!%p139_p2), %s381_s13, 1  ;;  %vm176_vm0 = vcmask (!%p139_p2), 523264   ;;  %v204_v14 = vld [vmem:[%s542_s1] sm:$0xff] (!%p139_p2)  ;;  %v205_v15 = vld [vmem:[%s542_s1 + $0x8] sm:$0xff] (!%p139_p2)  ;;  %v206_v17 = vld [vmem:[%s542_s1 + $0x10] sm:$0xff] (!%p139_p2) }
   0x6   : > { %142 = sbr.rel (%p139_p2) target bundleno = 853 (0x355), region = 32  ;;  %p163_p3 = scmp.lt.s32.totalorder (!%p139_p2), %s386_s14, 3  ;;  %v424_v16 = vpack.c.bf16 (!%p139_p2), %v205_v15, %v204_v14  ;;  %v207_v18 = vld [vmem:[%s542_s1 + $0x18] sm:$0xff] (!%p139_p2)  ;;  %v208_v20 = vld [vmem:[%s542_s1 + $0x20] sm:$0xff] (!%p139_p2)  ;;  %v209_v21 = vld [vmem:[%s542_s1 + $0x28] sm:$0xff] (!%p139_p2) }
   0x7   : > { %v428_v19 = vpack.c.bf16 (!%p139_p2), %v207_v18, %v206_v17  ;;  %v210_v22 = vld [vmem:[%s542_s1 + $0x30] sm:$0xff] (!%p139_p2)  ;;  %v432_v23 = vpack.c.bf16 (!%p139_p2), %v209_v21, %v208_v20  ;;  %v211_v24 = vld [vmem:[%s542_s1 + $0x38] sm:$0xff] (!%p139_p2)  ;;  %v390_v36 = vld [vmem:[%s543_s2] ss:$0 sm:$0xff] (!%p139_p2) }
   0x8   : > { %425 = vmatprep.subr.bf16.mxu0 (!%p139_p2), %v424_v16  ;;  %v436_v25 = vpack.c.bf16 (!%p139_p2), %v211_v24, %v210_v22 }
   0x9   : > { %427 = vmatpush3.bf16.msra.mxu0 (!%p139_p2), %v424_v16 }
   0xa   : > { %429 = vmatprep.subr.bf16.mxu0 (!%p139_p2), %v428_v19 }
   0xd   : > { %s546_s14 = smov (!%p163_p3, %s386_s14), 3  ;;  %431 = vmatpush3.bf16.msra.mxu0 %v428_v19 }
   0xe   : > { %s387_s15 = sshll.u32 %s546_s14, 3  ;;  %433 = vmatprep.subr.bf16.mxu0 %v432_v23 }
   0xf   : > { %s166_s18 = scalar_lea.vmem %s541_s0, %s387_s15  ;;  %s172_s13 = scalar_lea.vmem %s544_s3, %s387_s15 }
  0x10   : > { %v174_v0 = vld [vmem:[%s166_s18] sm:$0xff]  ;;  %v175_v1 = vld [vmem:[%s166_s18 + $0x8] sm:$0xff] }
  0x11   : > { %v177_v2 = vsel %vm176_vm0, %v174_v0, 0.0  ;;  %v180_v3 = vsel %vm176_vm0, %v175_v1, 0.0  ;;  %435 = vmatpush3.bf16.msra.mxu0 %v432_v23 }
  0x12   : > { %178 = vadd.xlane.f32.xlu0 %v177_v2  ;;  %437 = vmatprep.subr.bf16.mxu0 %v436_v25 }
  0x15   : > { %439 = vmatpush3.bf16.msra.mxu0 %v436_v25 }
  0x16   : > { %181 = vadd.xlane.f32.xlu0 %v180_v3 }
  0x9f   : > { %v179_v4 = vpop.xlane.xlu0 %178 }
  0xa0   : > { %v184_v5 = vmul.f32 0.015625, %v179_v4 }
  0xa2   : > { %v186_v6 = vsub.f32 %v174_v0, %v184_v5 }
  0xa3   : > { %v182_v7 = vpop.xlane.xlu0 %181 }
  0xa4   : > { %v185_v8 = vmul.f32 0.015625, %v182_v7  ;;  %v188_v9 = vmul.f32 %v186_v6, %v186_v6 }
  0xa6   : > { %v187_v10 = vsub.f32 %v175_v1, %v185_v8  ;;  %v190_v11 = vsel %vm176_vm0, %v188_v9, 0.0 }
  0xa7   : > { %191 = vadd.xlane.f32.xlu1 %v190_v11 }
  0xa8   : > { %v189_v12 = vmul.f32 %v187_v10, %v187_v10 }
  0xaa   : > { %v193_v13 = vsel %vm176_vm0, %v189_v12, 0.0 }
  0xab   : > { %194 = vadd.xlane.f32.xlu1 %v193_v13 }
 0x134   : > { %v192_v26 = vpop.xlane.xlu1 %191 }
 0x135   : > { %v196_v27 = vmul.f32 0.015625, %v192_v26 }
 0x137   : > { %v198_v28 = vadd.f32 1e-05, %v196_v27 }
 0x138   : > { %v195_v29 = vpop.xlane.xlu1 %194 }
 0x139   : > { %448 = vrsqrt.f32 %v198_v28  ;;  %v197_v30 = vmul.f32 0.015625, %v195_v29 }
 0x13b   : > { %v199_v31 = vadd.f32 1e-05, %v197_v30 }
 0x13d   : > { %450 = vrsqrt.f32 %v199_v31 }
 0x143   : > { %v449_v32 = vpop.eup %448 }
 0x144   : > { %v202_v33 = vmul.f32 %v449_v32, %v186_v6 }
 0x146   : > { %421 = vmatprep.mubr.msk.f32.mxu0 %vm176_vm0, %v202_v33 }
 0x147   : > { %v451_v34 = vpop.eup %450 }
 0x148   : > { %v203_v35 = vmul.f32 %v451_v34, %v187_v10 }
 0x14a   : > { %422 = vmatmul.mubr.msk.f32.vlgmr.msra.gmra.mrb[0].mxu0 %vm176_vm0, %v203_v35 }
 0x21d   : > { %v423_v37 = vpop.f32.mrb[0].mxu0 }
 0x21e   : > { %v297_v38 = vadd.f32 %v423_v37, %v390_v36  ;;  %v291_v39 = vpop.f32.mrb[1].mxu0 }
 0x21f   : > { %v292_v40 = vadd.f32 %v390_v36, %v291_v39 }
 0x220   : > { %302 = vadd.xlane.f32.xlu1 %v297_v38 }
 0x221   : > { %300 = vadd.xlane.f32.xlu0 %v292_v40 }
 0x2ad   : > { %v303_v41 = vpop.xlane.xlu1 %302 }
 0x2ae   : > { %v306_v42 = vmul.f32 0.0078125, %v303_v41  ;;  %v301_v43 = vpop.xlane.xlu0 %300 }
 0x2af   : > { %v305_v44 = vmul.f32 0.0078125, %v301_v43 }
 0x2b0   : > { %v308_v45 = vsub.f32 %v297_v38, %v306_v42 }
 0x2b1   : > { %v307_v46 = vsub.f32 %v292_v40, %v305_v44 }
 0x2b2   : > { %v310_v47 = vmul.f32 %v308_v45, %v308_v45 }
 0x2b3   : > { %v309_v48 = vmul.f32 %v307_v46, %v307_v46 }
 0x2b4   : > { %313 = vadd.xlane.f32.xlu1 %v310_v47 }
 0x2b5   : > { %311 = vadd.xlane.f32.xlu0 %v309_v48 }
 0x341   : > { %v314_v49 = vpop.xlane.xlu1 %313 }
 0x342   : > { %v316_v50 = vmul.f32 0.0078125, %v314_v49  ;;  %v312_v51 = vpop.xlane.xlu0 %311 }
 0x343   : > { %v315_v52 = vmul.f32 0.0078125, %v312_v51 }
 0x344   : > { %v318_v53 = vadd.f32 1e-05, %v316_v50 }
 0x345   : > { %v317_v54 = vadd.f32 1e-05, %v315_v52 }
 0x346   : > { %452 = vrsqrt.f32 %v318_v53 }
 0x347   : > { %454 = vrsqrt.f32 %v317_v54 }
 0x350   : > { %v453_v55 = vpop.eup %452 }
 0x351   : > { %v455_v56 = vpop.eup %454  ;;  %v322_v58 = vmul.f32 %v453_v55, %v308_v45 }
 0x352   : > { %v321_v57 = vmul.f32 %v455_v56, %v307_v46 }
 0x353   : > { %324 = vst [vmem:[%s172_s13 + $0x8] sm:$0xff] %v322_v58 }
 0x354   : > { %323 = vst [vmem:[%s172_s13] sm:$0xff] %v321_v57 }
 0x355 PF: > { %s13_s12 = sadd.s32 1, %s462_s12  }
 0x356   : > { %p10_p4 = scmp.ge.s32.totalorder %s13_s12, 4  }
 0x358   :  { %12 = sbr.rel (!%p10_p4) target bundleno = 1 (0x1), region = 62 }

</bundles_post_ra>
